<compile_context>
chip_gen: v7x
topology: tpu7x:2x2x1
jax: 0.10.0
libtpu: 0.0.40
codegen_flags: <defaults>
</compile_context>

<pallas_src>
import jax
import jax.numpy as jnp
from jax import lax
from jax.experimental import pallas as pl
from jax.experimental.pallas import tpu as pltpu


def attention_forward(hidden, encoder_outputs, len_src, w, v, *,
                      batch_tile=8, time_chunk=256, matmul_dtype=jnp.bfloat16):
    """Pallas forward of the Attention module.

    hidden:           (B, Dh)      decoder hidden state
    encoder_outputs:  (T, B, De)   encoder outputs (time-major, like the module)
    len_src:          (B,) int     valid source lengths
    w:                (H, 3H)      nn.Linear(3H, H).weight (PyTorch layout); bias zero-init
    v:                (H,)         attention vector
    returns:          (B, 1, T)    == F.softmax(attn_energies, dim=1).unsqueeze(1)
    """
    T, B, De = encoder_outputs.shape
    Dh = hidden.shape[1]
    H = w.shape[0]
    assert Dh + De == 3 * H, "concat feature dim must equal 3 * hidden_size"

    TB = batch_tile
    assert TB % 8 == 0, "batch tile must be sublane aligned"
    assert time_chunk % 128 == 0, "time chunk must be lane aligned"

    B_pad = ((B + TB - 1) // TB) * TB
    NB = B_pad // TB

    # Time tiling: one chunk if T is small, otherwise lane-aligned chunks.  The last
    # chunk may be a partial edge block; its garbage tail is masked before softmax.
    if T <= time_chunk:
        TC, NT = T, 1
    else:
        TC = time_chunk
        NT = -(-T // TC)
    T_total = NT * TC

    # Encoder outputs stay time-major f32 in HBM: no transpose / cast / pad pass.
    enc = encoder_outputs
    if B < TB:
        # Tiny batches only: pad the batch axis so the single batch block is in-bounds
        # (negligible copy).  For B >= TB the remainder is a partial edge block whose
        # garbage rows are simply sliced off at the end.
        enc = jnp.pad(enc, ((0, 0), (0, B_pad - B), (0, 0)))

    # Decompose the linear layer; pre-transpose the (tiny) weights so the kernel
    # contracts the minor feature axis directly.  cat order = [hidden, encoder].
    w_hT = w[:, :Dh].T.astype(matmul_dtype)             # (Dh, H)
    w_eT = w[:, Dh:].T.astype(matmul_dtype)             # (De, H)
    v_row = v.reshape(1, H).astype(jnp.float32)         # (1, H)

    hid = jnp.pad(hidden, ((0, B_pad - B), (0, 0))).astype(matmul_dtype)    # (B_pad, Dh)
    lens = jnp.full((B_pad, 1), T, dtype=jnp.int32).at[:B, 0].set(
        len_src.astype(jnp.int32))                                          # (B_pad, 1)

    def kernel(lens_ref, hid_ref, enc_ref, w_eT_ref, w_hT_ref, v_ref, o_ref, h_scr):
        tj = pl.program_id(1)

        # Decoder-hidden projection: once per batch tile, reused across all T chunks.
        @pl.when(tj == 0)
        def _():
            h_scr[...] = jnp.dot(hid_ref[...], w_hT_ref[...],
                                 preferred_element_type=jnp.float32)        # (TB, H)

        # One batched matmul for the whole (time-chunk x batch-tile) slab.
        enc_b = enc_ref[...].astype(matmul_dtype)                           # (TC, TB, De)
        e2 = jnp.dot(enc_b.reshape(TC * TB, De), w_eT_ref[...],
                     preferred_element_type=jnp.float32)                    # (TC*TB, H)
        energy = jnp.tanh(e2.reshape(TC, TB, H) + h_scr[...][None, :, :])   # f32
        scores = jnp.sum(energy * v_ref[...], axis=2)                       # (TC, TB) f32
        scores_bt = jnp.transpose(scores, (1, 0))                           # (TB, TC)

        if NT == 1:
            o_ref[...] = scores_bt                       # single dense store
        else:
            col = pl.multiple_of(tj * TC, TC)            # TC is a multiple of 128 here
            o_ref[:, pl.ds(col, TC)] = scores_bt         # lane-aligned column store

        # Finalize: length mask (also covers T -> T_total padding / edge-block garbage)
        # + exact softmax over the full time axis, one dense (TB, T_total) store.
        @pl.when(tj == NT - 1)
        def _():
            e_rows = o_ref[...]                                             # (TB, T_total)
            t_idx = lax.broadcasted_iota(jnp.int32, e_rows.shape, 1)
            e_rows = jnp.where(t_idx < lens_ref[...], e_rows, -1e30)        # finite mask
            m = jnp.max(e_rows, axis=1, keepdims=True)
            p = jnp.exp(e_rows - m)
            o_ref[...] = p / jnp.sum(p, axis=1, keepdims=True)              # exact norm

    # Rough VMEM budget: double-buffered blocks + resident weights + f32 temporaries.
    enc_blk = TC * TB * De * 4
    out_blk = TB * T_total * 4
    fixed = (De * H + Dh * H + TB * Dh) * 2 + (TB + H + TB * H) * 4
    temps = TC * TB * De * 2 + 2 * TC * TB * H * 4 + 2 * TC * TB * 4 + 2 * out_blk
    est = 2 * enc_blk + 2 * out_blk + 2 * fixed + temps
    vmem_limit = int(min(max(2 * est, 32 * 1024 * 1024), 48 * 1024 * 1024))

    grid_spec = pltpu.PrefetchScalarGridSpec(
        num_scalar_prefetch=0,
        grid=(NB, NT),
        in_specs=[
            pl.BlockSpec((TB, 1), lambda i, tj: (i, 0)),            # lens
            pl.BlockSpec((TB, Dh), lambda i, tj: (i, 0)),           # hidden tile
            pl.BlockSpec((TC, TB, De), lambda i, tj: (tj, i, 0)),   # enc chunk (time-major)
            pl.BlockSpec((De, H), lambda i, tj: (0, 0)),            # W_e^T (resident)
            pl.BlockSpec((Dh, H), lambda i, tj: (0, 0)),            # W_h^T (resident)
            pl.BlockSpec((1, H), lambda i, tj: (0, 0)),             # v     (resident)
        ],
        out_specs=pl.BlockSpec((TB, T_total), lambda i, tj: (i, 0)),
        scratch_shapes=[pltpu.VMEM((TB, H), jnp.float32)],
    )

    out_padded = pl.pallas_call(
        kernel,
        out_shape=jax.ShapeDtypeStruct((B_pad, T_total), jnp.float32),
        grid_spec=grid_spec,
        compiler_params=pltpu.CompilerParams(
            dimension_semantics=("parallel", "arbitrary"),
            vmem_limit_bytes=vmem_limit,
        ),
    )(lens, hid, enc, w_eT, w_hT, v_row)

    return out_padded[:B, :T][:, None, :]                            # (B, 1, T)


def attention_reference(hidden, encoder_outputs, len_src, w, v):
    """Plain-JAX (f32) mirror of the PyTorch forward, for verification."""
    T, B, De = encoder_outputs.shape
    h = jnp.broadcast_to(hidden[:, None, :], (B, T, hidden.shape[1]))
    enc = jnp.transpose(encoder_outputs, (1, 0, 2))
    cat = jnp.concatenate([h, enc], axis=2)                          # (B, T, 3H)
    energy = jnp.tanh(cat @ w.T)                                     # (B, T, H)
    e = jnp.einsum("bth,h->bt", energy, v)                           # (B, T)
    t_idx = jnp.arange(T)[None, :]
    e = jnp.where(t_idx < len_src[:, None], e, -jnp.inf)
    return jax.nn.softmax(e, axis=1)[:, None, :]                     # (B, 1, T)


if __name__ == "__main__":
    # Shapes consistent with the module: hidden_size H, decoder hidden = 2H,
    # encoder output = H (so the concat feature dim is 3H).
    H = 32
    B = 2
    T = 8
    Dh, De = 2 * H, H

    key = jax.random.PRNGKey(0)
    k_w, k_v, k_h, k_e = jax.random.split(key, 4)

    # Deterministic parameter init (module __init__: uniform(-stdv, stdv), bias zeroed).
    stdv_w = 1.0 / jnp.sqrt(jnp.float32(3 * H))
    w = jax.random.uniform(k_w, (H, 3 * H), jnp.float32, -stdv_w, stdv_w)
    stdv_v = 1.0 / jnp.sqrt(jnp.float32(H))
    v = jax.random.uniform(k_v, (H,), jnp.float32, -stdv_v, stdv_v)

    hidden = jax.random.normal(k_h, (B, Dh), jnp.float32)
    encoder_outputs = jax.random.normal(k_e, (T, B, De), jnp.float32)
    len_src = jnp.array([5, 8], dtype=jnp.int32)   # one partially-masked row, one full row

    out = attention_forward(hidden, encoder_outputs, len_src, w, v)
    out = jax.block_until_ready(out)

    ref = attention_reference(hidden, encoder_outputs, len_src, w, v)
    assert out.shape == (B, 1, T)
    # bf16 matmul operands -> compare with a modest absolute tolerance.
    assert jnp.allclose(out, ref, atol=1e-2, rtol=0.0), (out, ref)
    # masked positions are exactly zero and rows sum to ~1 over T
    assert jnp.all(out[0, 0, 5:] == 0.0)
    assert jnp.allclose(out.sum(axis=-1), 1.0, atol=1e-3)

    print("KERNEL_OK")
</pallas_src>

<mosaic_0001>
module attributes {stable_mosaic.version = 11 : i64} {
  func.func @kernel(%arg0: i32, %arg1: i32, %arg2: memref<8x1xi32, #tpu.memory_space<vmem>>, %arg3: memref<8x64xbf16, #tpu.memory_space<vmem>>, %arg4: memref<8x8x32xf32, #tpu.memory_space<vmem>>, %arg5: memref<32x32xbf16, #tpu.memory_space<vmem>>, %arg6: memref<64x32xbf16, #tpu.memory_space<vmem>>, %arg7: memref<1x32xf32, #tpu.memory_space<vmem>>, %arg8: memref<8x8xf32, #tpu.memory_space<vmem>>, %arg9: memref<8x32xf32, #tpu.memory_space<vmem>>) attributes {dimension_semantics = [#tpu.dimension_semantics<parallel>, #tpu.dimension_semantics<arbitrary>], iteration_bounds = array<i64: 1, 1>, scalar_prefetch = 0 : i64, scratch_operands = 1 : i64, tpu.core_type = #tpu.core_type<tc>, window_params = [{transform_indices = @transform_0, window_bounds = array<i64: 8, 1>}, {transform_indices = @transform_1, window_bounds = array<i64: 8, 64>}, {transform_indices = @transform_2, window_bounds = array<i64: 8, 8, 32>}, {pipeline_mode = #tpu.pipeline_mode<synchronous>, transform_indices = @transform_3, window_bounds = array<i64: 32, 32>}, {pipeline_mode = #tpu.pipeline_mode<synchronous>, transform_indices = @transform_4, window_bounds = array<i64: 64, 32>}, {pipeline_mode = #tpu.pipeline_mode<synchronous>, transform_indices = @transform_5, window_bounds = array<i64: 1, 32>}, {transform_indices = @transform_6, window_bounds = array<i64: 8, 8>}]} {
    %c0_i32 = arith.constant 0 : i32
    %0 = arith.cmpi eq, %arg1, %c0_i32 : i32
    %1 = arith.extui %0 : i1 to i32
    %c0_i32_0 = arith.constant 0 : i32
    %2 = arith.cmpi ne, %1, %c0_i32_0 : i32
    scf.if %2 {
      %c0_14 = arith.constant 0 : index
      %c0_15 = arith.constant 0 : index
      %24 = vector.load %arg3[%c0_14, %c0_15] : memref<8x64xbf16, #tpu.memory_space<vmem>>, vector<8x64xbf16>
      %c0_16 = arith.constant 0 : index
      %c0_17 = arith.constant 0 : index
      %25 = vector.load %arg6[%c0_16, %c0_17] : memref<64x32xbf16, #tpu.memory_space<vmem>>, vector<64x32xbf16>
      %cst_18 = arith.constant dense<0.000000e+00> : vector<8x32xf32>
      %26 = tpu.matmul %24, %25, %cst_18 {dimension_numbers = #tpu.dot_dimension_numbers<[1], [0], [0], [1], [0, 0, 1, 1], [], []>} : vector<8x64xbf16>, vector<64x32xbf16>, vector<8x32xf32> -> vector<8x32xf32>
      %c0_19 = arith.constant 0 : index
      %c0_20 = arith.constant 0 : index
      %27 = vector.load %arg9[%c0_19, %c0_20] : memref<8x32xf32, #tpu.memory_space<vmem>>, vector<8x32xf32>
      tpu.vector_store %arg9[%c0_19, %c0_20], %26 {strides = array<i32>} : memref<8x32xf32, #tpu.memory_space<vmem>>, vector<8x32xf32>,
    } else {
    }
    %c0 = arith.constant 0 : index
    %c0_1 = arith.constant 0 : index
    %c0_2 = arith.constant 0 : index
    %3 = vector.load %arg4[%c0, %c0_1, %c0_2] : memref<8x8x32xf32, #tpu.memory_space<vmem>>, vector<8x8x32xf32>
    %4 = arith.truncf %3 : vector<8x8x32xf32> to vector<8x8x32xbf16>
    %5 = vector.shape_cast %4 : vector<8x8x32xbf16> to vector<64x32xbf16>
    %c0_3 = arith.constant 0 : index
    %c0_4 = arith.constant 0 : index
    %6 = vector.load %arg5[%c0_3, %c0_4] : memref<32x32xbf16, #tpu.memory_space<vmem>>, vector<32x32xbf16>
    %cst = arith.constant dense<0.000000e+00> : vector<64x32xf32>
    %7 = tpu.matmul %5, %6, %cst {dimension_numbers = #tpu.dot_dimension_numbers<[1], [0], [0], [1], [0, 0, 1, 1], [], []>} : vector<64x32xbf16>, vector<32x32xbf16>, vector<64x32xf32> -> vector<64x32xf32>
    %8 = vector.shape_cast %7 : vector<64x32xf32> to vector<8x8x32xf32>
    %c0_5 = arith.constant 0 : index
    %c0_6 = arith.constant 0 : index
    %9 = vector.load %arg9[%c0_5, %c0_6] : memref<8x32xf32, #tpu.memory_space<vmem>>, vector<8x32xf32>
    %10 = vector.shape_cast %9 : vector<8x32xf32> to vector<1x8x32xf32>
    %11 = vector.broadcast %10 : vector<1x8x32xf32> to vector<8x8x32xf32>
    %12 = arith.addf %8, %11 : vector<8x8x32xf32>
    %13 = math.tanh %12 : vector<8x8x32xf32>
    %c0_7 = arith.constant 0 : index
    %c0_8 = arith.constant 0 : index
    %14 = vector.load %arg7[%c0_7, %c0_8] : memref<1x32xf32, #tpu.memory_space<vmem>>, vector<1x32xf32>
    %15 = vector.shape_cast %14 : vector<1x32xf32> to vector<1x1x32xf32>
    %16 = vector.broadcast %15 : vector<1x1x32xf32> to vector<8x8x32xf32>
    %17 = arith.mulf %13, %16 : vector<8x8x32xf32>
    %cst_9 = arith.constant dense<0.000000e+00> : vector<8x8xf32>
    %18 = vector.multi_reduction <add>, %17, %cst_9 [2] : vector<8x8x32xf32> to vector<8x8xf32>
    %19 = tpu.transpose %18, [1, 0] : vector<8x8xf32> -> vector<8x8xf32>
    %c0_10 = arith.constant 0 : index
    %c0_11 = arith.constant 0 : index
    %20 = vector.load %arg8[%c0_10, %c0_11] : memref<8x8xf32, #tpu.memory_space<vmem>>, vector<8x8xf32>
    tpu.vector_store %arg8[%c0_10, %c0_11], %19 {strides = array<i32>} : memref<8x8xf32, #tpu.memory_space<vmem>>, vector<8x8xf32>,
    %c0_i32_12 = arith.constant 0 : i32
    %21 = arith.cmpi eq, %arg1, %c0_i32_12 : i32
    %22 = arith.extui %21 : i1 to i32
    %c0_i32_13 = arith.constant 0 : i32
    %23 = arith.cmpi ne, %22, %c0_i32_13 : i32
    scf.if %23 {
      %c0_14 = arith.constant 0 : index
      %c0_15 = arith.constant 0 : index
      %24 = vector.load %arg8[%c0_14, %c0_15] : memref<8x8xf32, #tpu.memory_space<vmem>>, vector<8x8xf32>
      %25 = tpu.iota {dimensions = array<i32: 1>} : vector<8x8xi32>
      %c0_16 = arith.constant 0 : index
      %c0_17 = arith.constant 0 : index
      %26 = vector.load %arg2[%c0_16, %c0_17] : memref<8x1xi32, #tpu.memory_space<vmem>>, vector<8x1xi32>
      %27 = vector.broadcast %26 : vector<8x1xi32> to vector<8x8xi32>
      %28 = arith.cmpi slt, %25, %27 : vector<8x8xi32>
      %cst_18 = arith.constant -1.000000e+30 : f32
      %29 = vector.broadcast %cst_18 : f32 to vector<8x8xf32>
      %30 = arith.select %28, %24, %29 : vector<8x8xi1>, vector<8x8xf32>
      %cst_19 = arith.constant dense<0xFF800000> : vector<8xf32>
      %31 = vector.multi_reduction <maximumf>, %30, %cst_19 [1] : vector<8x8xf32> to vector<8xf32>
      %32 = vector.shape_cast %31 : vector<8xf32> to vector<8x1xf32>
      %33 = vector.broadcast %32 : vector<8x1xf32> to vector<8x8xf32>
      %34 = arith.subf %30, %33 : vector<8x8xf32>
      %35 = math.exp %34 : vector<8x8xf32>
      %cst_20 = arith.constant dense<0.000000e+00> : vector<8xf32>
      %36 = vector.multi_reduction <add>, %35, %cst_20 [1] : vector<8x8xf32> to vector<8xf32>
      %37 = vector.shape_cast %36 : vector<8xf32> to vector<8x1xf32>
      %38 = vector.broadcast %37 : vector<8x1xf32> to vector<8x8xf32>
      %39 = arith.divf %35, %38 : vector<8x8xf32>
      %c0_21 = arith.constant 0 : index
      %c0_22 = arith.constant 0 : index
      %40 = vector.load %arg8[%c0_21, %c0_22] : memref<8x8xf32, #tpu.memory_space<vmem>>, vector<8x8xf32>
      tpu.vector_store %arg8[%c0_21, %c0_22], %39 {strides = array<i32>} : memref<8x8xf32, #tpu.memory_space<vmem>>, vector<8x8xf32>,
    } else {
    }
    return
  }
  func.func @transform_0(%arg0: i32, %arg1: i32) -> (i32, i32) {
    %c0_i32 = arith.constant 0 : i32
    %c0_i32_0 = arith.constant 0 : i32
    return %arg0, %c0_i32 : i32, i32
  }
  func.func @transform_1(%arg0: i32, %arg1: i32) -> (i32, i32) {
    %c0_i32 = arith.constant 0 : i32
    %c0_i32_0 = arith.constant 0 : i32
    return %arg0, %c0_i32 : i32, i32
  }
  func.func @transform_2(%arg0: i32, %arg1: i32) -> (i32, i32, i32) {
    %c0_i32 = arith.constant 0 : i32
    %c0_i32_0 = arith.constant 0 : i32
    return %arg1, %arg0, %c0_i32 : i32, i32, i32
  }
  func.func @transform_3(%arg0: i32, %arg1: i32) -> (i32, i32) {
    %c0_i32 = arith.constant 0 : i32
    %c0_i32_0 = arith.constant 0 : i32
    %c0_i32_1 = arith.constant 0 : i32
    return %c0_i32, %c0_i32_0 : i32, i32
  }
  func.func @transform_4(%arg0: i32, %arg1: i32) -> (i32, i32) {
    %c0_i32 = arith.constant 0 : i32
    %c0_i32_0 = arith.constant 0 : i32
    %c0_i32_1 = arith.constant 0 : i32
    return %c0_i32, %c0_i32_0 : i32, i32
  }
  func.func @transform_5(%arg0: i32, %arg1: i32) -> (i32, i32) {
    %c0_i32 = arith.constant 0 : i32
    %c0_i32_0 = arith.constant 0 : i32
    %c0_i32_1 = arith.constant 0 : i32
    return %c0_i32, %c0_i32_0 : i32, i32
  }
  func.func @transform_6(%arg0: i32, %arg1: i32) -> (i32, i32) {
    %c0_i32 = arith.constant 0 : i32
    %c0_i32_0 = arith.constant 0 : i32
    return %arg0, %c0_i32 : i32, i32
  }
}

</mosaic_0001>

<bundles_post_ra>
// kernel: tpu_custom_call.1
= control target key start
LH: loop header
LB: loop body
LE: loop exit
PB: predicated region body
PF: predicated region fallthrough
CT: control target
= control target key end

     0   :  { %11 = vsyncpa [#allocation4], 0  ;;  %s756_s0 = inlined_call_operand.vmem [shape: s32[8,1], index: 0, kind: input, shape index: {}]   ;;  %s757_s1 = inlined_call_operand.hbm [shape: bf16[8,64], index: 1, kind: input, shape index: {}]   ;;  %s758_s2 = inlined_call_operand.vmem [shape: f32[8,8,32], index: 2, kind: input, shape index: {}]   ;;  %s759_s3 = inlined_call_operand.hbm [shape: bf16[32,32], index: 3, kind: input, shape index: {}]   ;;  %s760_s4 = inlined_call_operand.vmem [shape: bf16[64,32], index: 4, kind: input, shape index: {}]   ;;  %s761_s5 = inlined_call_operand.vmem [shape: f32[1,32], index: 5, kind: input, shape index: {}]   ;;  %s762_s6 = inlined_call_operand.hbm [shape: f32[8,8], index: 6, kind: output, shape index: {}]  }
   0x1   :  { %12 = vsyncpa [#allocation7], 0 }
   0x2   :  { %13 = vsyncpa [#allocation5], 0  ;;  %s611_s21 = smov [#allocation3]   ;;  %s612_s23 = smov [#allocation6]  }
   0x3   :  { %s22_s22 = sshll.u32 %s611_s21, 4  ;;  %s33_s24 = sshll.u32 %s612_s23, 4  ;;  %s23_s22 = int_to_ptr.vmem [resolvable:$true] %s22_s22  ;;  %s654_s24 = int_to_ptr.vmem [resolvable:$true] %s33_s24 }
   0x4   :  { %s539_s27 = scalar_lea.hbm %s757_s1, 64 }
   0x5   :  { %p540_p0 = scmp.ne.s32.totalorder %s757_s1, %s539_s27  ;;  %p543_p1 = scmp.lt.u32.totalorder %s539_s27, %s757_s1 }
   0x7   :  { %p545_p2 = pnand %p543_p1, %p540_p0 }
   0x9   :  { %548 = shalt.err (!%p545_p2)
}
   0xa   :  { %s549_s8 = scalar_lea.vmem %s23_s22, 64  ;;  %p554_p4 = scmp.lt.s32.totalorder %s23_s22, %s23_s22 }
   0xb   :  { %p550_p3 = scmp.ne.s32.totalorder %s23_s22, %s549_s8  ;;  %p555_p5 = scmp.lt.s32.totalorder %s549_s8, %s549_s8 }
   0xd   :  { %p556_p6 = por %p555_p5, %p554_p4 }
   0xf   :  { %p557_p7 = pnand %p556_p6, %p550_p3 }
  0x11   :  { %560 = shalt.err (!%p557_p7)
}
  0x12   :  { %25 = dma.hbm_to_vmem [thread:$0]  %s757_s1, 64, %s23_s22, [#allocation4]  }
  0x13   :  { %s561_s13 = scalar_lea.hbm %s759_s3, 256 }
  0x14   :  { %p562_p8 = scmp.ne.s32.totalorder %s759_s3, %s561_s13  ;;  %p565_p9 = scmp.lt.u32.totalorder %s561_s13, %s759_s3 }
  0x16   :  { %p567_p10 = pnand %p565_p9, %p562_p8 }
  0x18   :  { %570 = shalt.err (!%p567_p10)
}
  0x19   :  { %s571_s18 = scalar_lea.vmem %s654_s24, 256  ;;  %p576_p12 = scmp.lt.s32.totalorder %s654_s24, %s654_s24 }
  0x1a   :  { %p572_p11 = scmp.ne.s32.totalorder %s654_s24, %s571_s18  ;;  %p577_p13 = scmp.lt.s32.totalorder %s571_s18, %s571_s18 }
  0x1c   :  { %p578_p0 = por %p577_p13, %p576_p12 }
  0x1e   :  { %p579_p1 = pnand %p578_p0, %p572_p11 }
  0x20   :  { %582 = shalt.err (!%p579_p1)
}
  0x21   :  { %s613_s1 = smov 64   ;;  %s614_s19 = smov 4  }
  0x22   :  { %39 = dma.hbm_to_vmem [thread:$0]  %s759_s3, 256, %s654_s24, [#allocation7], %s613_s1, %s613_s1, %s614_s19  }
  0x23   :  { %605 = dma.done.wait [#allocation4], 64  }
  0x24   :  { %606 = vsyncadd [#allocation4], 4294967232 }
  0x25   :  { %607 = dma.done.wait [#allocation7], 256  }
  0x26   :  { %608 = vsyncadd [#allocation7], 4294967040  ;;  %v615_v0 = vmov 0.0   ;;  %vm616_vm0 = vmmov 0   ;;  %v513_v1 = vld [vmem:[%s760_s4] sm:$0xff]   ;;  %v514_v2 = vld [vmem:[%s760_s4 + $0x8] sm:$0xff]  }
  0x27   :  { %480 = vmatprep.subr.bf16.mxu0 %v615_v0  ;;  %488 = vmatprep.mubr.msk.bf16.mxu0 %vm616_vm0, %v615_v0  ;;  %v515_v3 = vld [vmem:[#allocation6] sm:$0xff]   ;;  %v517_v4 = vld [vmem:[#allocation6 + $0x8] sm:$0xff]   ;;  %vm132_vm1 = vcmask 261120   ;;  %v516_v7 = vld [vmem:[%s760_s4 + $0x10] sm:$0xff]   ;;  %vm88_vm2 = vcmask 523264   ;;  %vm362_vm3 = vcmask 1041409  }
  0x28   :  { %481 = vmatpush3.bf16.msra.mxu0 %v513_v1  ;;  %492 = vmatprep.subr.bf16.mxu1 %v515_v3  ;;  %v134_v5 = vld [vmem:[%s758_s2] sm:$0xff]  ;;  %v135_v6 = vld [vmem:[%s758_s2 + $0x8] sm:$0xff]  ;;  %v136_v9 = vld [vmem:[%s758_s2 + $0x10] sm:$0xff]  ;;  %vm364_vm4 = vcmask 1042434   ;;  %vm366_vm5 = vcmask 1043459   ;;  %vm368_vm6 = vcmask 1044484  }
  0x29   :  { %482 = vmatprep.subr.bf16.mxu0 %v615_v0  ;;  %493 = vmatpush3.bf16.msra.mxu1 %v515_v3  ;;  %v465_v8 = vpack.c.bf16 %v135_v6, %v134_v5  ;;  %v137_v10 = vld [vmem:[%s758_s2 + $0x18] sm:$0xff]  ;;  %v138_v11 = vld [vmem:[%s758_s2 + $0x20] sm:$0xff]  ;;  %v139_v13 = vld [vmem:[%s758_s2 + $0x28] sm:$0xff]  ;;  %vm370_vm7 = vcmask 1045509   ;;  %vm372_vm8 = vcmask 1046534   ;;  %vm374_vm9 = vcmask 1047559  }
  0x2a   :  { %494 = vmatprep.subr.bf16.mxu1 %v517_v4  ;;  %v466_v12 = vpack.c.bf16 %v137_v10, %v136_v9  ;;  %v467_v14 = vpack.c.bf16 %v139_v13, %v138_v11  ;;  %v518_v15 = vld [vmem:[%s760_s4 + $0x18] sm:$0xff]   ;;  %v140_v16 = vld [vmem:[%s758_s2 + $0x30] sm:$0xff]  ;;  %v464_v41 = vld [vmem:[%s761_s5] ss:$0 sm:$0xff]  ;;  %vm409_vm10 = vcmask 64512  }
  0x2b   :  { %496 = vmatprep.mubr.msk.bf16.mxu1 %vm132_vm1, %v465_v8  ;;  %v141_v17 = vld [vmem:[%s758_s2 + $0x38] sm:$0xff]  ;;  %v415_v3 = vld [vmem:[%s756_s0] sm:$0xff]  ;;  %s618_s0 = smov [#allocation8]  }
  0x2c   :  { %483 = vmatpush3.bf16.msra.mxu0 %v514_v2  ;;  %v55_v18 = vld [vmem:[#allocation3] sm:$0xf]  ;;  %v468_v19 = vpack.c.bf16 %v141_v17, %v140_v16  ;;  %v617_v2 = vmov 0   ;;  %s439_s21 = sshll.u32 %s618_s0, 4  ;;  %s440_s21 = int_to_ptr.vmem [resolvable:$true] %s439_s21 }
  0x2d   :  { %484 = vmatprep.subr.bf16.mxu0 %v615_v0  ;;  %495 = vmatpush3.bf16.msra.mxu1 %v517_v4  ;;  %v328_v4 = vlaneseq  ;;  %s583_s22 = scalar_lea.vmem %s440_s21, 128  ;;  %p588_p3 = scmp.lt.s32.totalorder %s440_s21, %s440_s21 }
  0x2e   :  { %512 = vset.pattern.permute.xlu0 %v617_v2  ;;  %p584_p2 = scmp.ne.s32.totalorder %s440_s21, %s583_s22  ;;  %p589_p4 = scmp.lt.s32.totalorder %s583_s22, %s583_s22 }
  0x2f   :  { %v329_v5 = vand.u32 127, %v328_v4  ;;  %v331_v6 = vshrl.u32 %v328_v4, 7 }
  0x30   :  { %485 = vmatpush3.bf16.msra.mxu0 %v516_v7  ;;  %497 = vmatmul.mubr.msk.bf16.vlgmr.msra.gmra.mrb[0].mxu1 %vm132_vm1, %v466_v12  ;;  %p590_p5 = por %p589_p4, %p588_p3 }
  0x31   :  { %486 = vmatprep.subr.bf16.mxu0 %v615_v0  ;;  %500 = vmatprep.mubr.msk.bf16.mxu1 %vm132_vm1, %v467_v14  ;;  %v332_v9 = vsub.s32 %v329_v5, %v331_v6 }
  0x32   :  { %p591_p6 = pnand %p590_p5, %p584_p2 }
  0x34   :  { %487 = vmatpush3.bf16.msra.mxu0 %v518_v15 }
  0x37   :  { %489 = vmatmul.mubr.msk.bf16.vlgmr.msra.gmra.mrb[0].mxu0 %vm88_vm2, %v55_v18 }
  0x38   :  { %501 = vmatmul.mubr.msk.bf16.gmra.mrb[4].mxu1 %vm132_vm1, %v468_v19 }
 0x103   :  { %v498_v20 = vpop.f32.mrb[0].mxu1 }
 0x104   :  { %v233_v21 = vpop.f32.mrb[1].mxu1 }
 0x105   :  { %v499_v22 = vpop.f32.mrb[2].mxu1 }
 0x106   :  { %v236_v23 = vpop.f32.mrb[3].mxu1 }
 0x10a   :  { %v126_v24 = vpop.f32.mrb[0].mxu0 }
 0x10b   :  { %133 = vst.msk [vmem:[#allocation2] sm:$0xff] %vm132_vm1, %v126_v24  ;;  %v490_v25 = vpop.f32.mrb[1].mxu0  ;;  %v502_v28 = vpop.f32.mrb[4].mxu1 }
 0x10c   :  { %v129_v26 = vpop.f32.mrb[2].mxu0  ;;  %v249_v29 = vpop.f32.mrb[5].mxu1 }
 0x10d   :  { %v491_v27 = vpop.f32.mrb[3].mxu0  ;;  %v503_v30 = vpop.f32.mrb[6].mxu1 }
 0x10e   :  { %v252_v31 = vpop.f32.mrb[7].mxu1 }
 0x112   :  { %v264_v32 = vld [vmem:[#allocation2] sm:$0xff] }
 0x113   :  { %v267_v33 = vadd.f32 %v498_v20, %v264_v32  ;;  %v265_v34 = vadd.f32 %v264_v32, %v233_v21  ;;  %v268_v35 = vadd.f32 %v499_v22, %v264_v32  ;;  %v266_v36 = vadd.f32 %v264_v32, %v236_v23 }
 0x114   :  { %v269_v37 = vadd.f32 %v264_v32, %v249_v29  ;;  %v270_v38 = vadd.f32 %v264_v32, %v252_v31  ;;  %v272_v39 = vadd.f32 %v503_v30, %v264_v32  ;;  %v271_v40 = vadd.f32 %v502_v28, %v264_v32 }
 0x115   :  { %519 = vtanh.f32 %v267_v33 }
 0x116   :  { %521 = vtanh.f32 %v265_v34 }
 0x117   :  { %523 = vtanh.f32 %v268_v35 }
 0x118   :  { %525 = vtanh.f32 %v266_v36 }
 0x119   :  { %527 = vtanh.f32 %v269_v37 }
 0x11a   :  { %529 = vtanh.f32 %v270_v38 }
 0x11b   :  { %531 = vtanh.f32 %v272_v39 }
 0x11c   :  { %533 = vtanh.f32 %v271_v40 }
 0x11f   :  { %v520_v42 = vpop.eup %519 }
 0x120   :  { %v522_v43 = vpop.eup %521  ;;  %v290_v44 = vmul.f32 %v520_v42, %v464_v41 }
 0x121   :  { %v524_v45 = vpop.eup %523  ;;  %v288_v46 = vmul.f32 %v522_v43, %v464_v41 }
 0x122   :  { %v526_v47 = vpop.eup %525  ;;  %v302_v48 = vsel %vm132_vm1, %v290_v44, 0.0  ;;  %v291_v49 = vmul.f32 %v524_v45, %v464_v41 }
 0x123   :  { %303 = vadd.xlane.f32.xlu1 %v302_v48  ;;  %v296_v50 = vsel %vm132_vm1, %v288_v46, 0.0  ;;  %v289_v51 = vmul.f32 %v526_v47, %v464_v41  ;;  %v528_v52 = vpop.eup %527 }
 0x124   :  { %297 = vadd.xlane.f32.xlu0 %v296_v50  ;;  %v530_v53 = vpop.eup %529  ;;  %v305_v54 = vsel %vm132_vm1, %v291_v49, 0.0  ;;  %v292_v58 = vmul.f32 %v528_v52, %v464_v41 }
 0x125   :  { %v532_v55 = vpop.eup %531  ;;  %v299_v56 = vsel %vm132_vm1, %v289_v51, 0.0  ;;  %v293_v57 = vmul.f32 %v530_v53, %v464_v41 }
 0x126   :  { %v534_v59 = vpop.eup %533  ;;  %v295_v61 = vmul.f32 %v532_v55, %v464_v41  ;;  %v308_v62 = vsel %vm132_vm1, %v292_v58, 0.0 }
 0x127   :  { %306 = vadd.xlane.f32.xlu1 %v305_v54  ;;  %v311_v60 = vsel %vm132_vm1, %v293_v57, 0.0  ;;  %v294_v63 = vmul.f32 %v534_v59, %v464_v41 }
 0x128   :  { %300 = vadd.xlane.f32.xlu0 %v299_v56  ;;  %v317_v0 = vsel %vm132_vm1, %v295_v61, 0.0 }
 0x129   :  { %v314_v1 = vsel %vm132_vm1, %v294_v63, 0.0 }
 0x12b   :  { %312 = vadd.xlane.f32.xlu1 %v311_v60 }
 0x12c   :  { %309 = vadd.xlane.f32.xlu0 %v308_v62 }
 0x12f   :  { %318 = vadd.xlane.f32.xlu1 %v317_v0 }
 0x130   :  { %315 = vadd.xlane.f32.xlu0 %v314_v1 }
 0x146   :  { %417 = vperm.xlu0 %512, %v415_v3  }
 0x1b0   :  { %v304_v7 = vpop.xlane.xlu1 %303 }
 0x1b1   :  { %v298_v8 = vpop.xlane.xlu0 %297  ;;  %v341_v14 = vrot.slane %v304_v7, %v332_v9 }
 0x1b2   :  { %v333_v12 = vrot.slane %v298_v8, %v332_v9 }
 0x1b4   :  { %v307_v10 = vpop.xlane.xlu1 %306 }
 0x1b5   :  { %v301_v11 = vpop.xlane.xlu0 %300  ;;  %v345_v15 = vrot.slane %v307_v10, %v332_v9 }
 0x1b6   :  { %v337_v13 = vrot.slane %v301_v11, %v332_v9 }
 0x1b8   :  { %v363_v16 = vsel %vm362_vm3, %v337_v13, %v333_v12  ;;  %v313_v17 = vpop.xlane.xlu1 %312 }
 0x1b9   :  { %v365_v18 = vsel %vm364_vm4, %v341_v14, %v363_v16  ;;  %v310_v19 = vpop.xlane.xlu0 %309  ;;  %v353_v22 = vrot.slane %v313_v17, %v332_v9 }
 0x1ba   :  { %v367_v20 = vsel %vm366_vm5, %v345_v15, %v365_v18  ;;  %v349_v21 = vrot.slane %v310_v19, %v332_v9 }
 0x1bc   :  { %v369_v23 = vsel %vm368_vm6, %v349_v21, %v367_v20  ;;  %v319_v24 = vpop.xlane.xlu1 %318 }
 0x1bd   :  { %v361_v25 = vrot.slane %v319_v24, %v332_v9  ;;  %v316_v26 = vpop.xlane.xlu0 %315  ;;  %v371_v28 = vsel %vm370_vm7, %v353_v22, %v369_v23 }
 0x1be   :  { %v357_v27 = vrot.slane %v316_v26, %v332_v9 }
 0x1c0   :  { %v373_v29 = vsel %vm372_vm8, %v357_v27, %v371_v28 }
 0x1c1   :  { %v375_v30 = vsel %vm374_vm9, %v361_v25, %v373_v29 }
 0x1c2   :  { %377 = vxpose.xlu1.b32.start.end [1/1] (short) (narrow) %v375_v30, 8 }
 0x1c5   :  { %v418_v32 = vpop.permute.xlu0 %417 }
 0x1c6   :  { %vm419_vm11 = vcmp.lt.s32.totalorder %v329_v5, %v418_v32 }
 0x242   :  { %v393_v31 = vpop.trf.xlu1 }
 0x243   :  { %410 = vst.msk [vmem:[#allocation8] sm:$0xff] %vm409_vm10, %v393_v31 }
 0x24a   :  { %v414_v33 = vld [vmem:[#allocation8] sm:$0xff] }
 0x24b   :  { %v420_v34 = vsel %vm419_vm11, %v414_v33, -1e+30 }
 0x24c   :  { %v421_v35 = vsel %vm409_vm10, %v420_v34, -inf }
 0x24d   :  { %422 = vmax.xlane.f32.xlu0 %v421_v35 }
 0x2da   :  { %v423_v36 = vpop.xlane.xlu0 %422 }
 0x2db   :  { %v424_v37 = vsub.f32 %v420_v34, %v423_v36 }
 0x2dd   :  { %v425_v38 = vmul.f32 1.442695, %v424_v37 }
 0x2df   :  { %535 = vpow2.f32 %v425_v38 }
 0x2e9   :  { %v536_v39 = vpop.eup %535 }
 0x2ea   :  { %v427_v40 = vsel %vm409_vm10, %v536_v39, 0.0 }
 0x2eb   :  { %428 = vadd.xlane.f32.xlu1 %v427_v40 }
 0x378   :  { %v429_v41 = vpop.xlane.xlu1 %428 }
 0x379   :  { %537 = vrcp.f32 %v429_v41 }
 0x383   :  { %v538_v42 = vpop.eup %537 }
 0x384   :  { %v431_v43 = vmul.f32 %v538_v42, %v536_v39 }
 0x386   :  { %432 = vst.msk [vmem:[#allocation8] sm:$0xff] %vm409_vm10, %v431_v43 }
 0x387   :  { %594 = shalt.err (!%p591_p6)
}
 0x388   :  { %s595_s26 = scalar_lea.hbm %s762_s6, 128 }
 0x389   :  { %p596_p7 = scmp.ne.s32.totalorder %s762_s6, %s595_s26  ;;  %p599_p8 = scmp.lt.u32.totalorder %s595_s26, %s762_s6 }
 0x38b   :  { %p601_p9 = pnand %p599_p8, %p596_p7 }
 0x38d   :  { %604 = shalt.err (!%p601_p9)
}
 0x38e   :  { %442 = dma.vmem_to_hbm [thread:$0]  %s440_s21, 128, %s762_s6, [#allocation5]  }
 0x38f   :  { %609 = dma.done.wait [#allocation5], 128  }
 0x390   :  { %610 = vsyncadd [#allocation5], 4294967168 }
 0x391   :  { %446 = vsyncpa [#allocation4], 1 }
 0x392   :  { %447 = vsyncpa [#allocation7], 1 }
 0x393   :  { %448 = vsyncpa [#allocation5], 1 }

</bundles_post_ra>
